<compile_context>
chip_gen: v7x
topology: tpu7x:2x2x1
jax: 0.10.0
libtpu: 0.0.40
codegen_flags: <defaults>
</compile_context>

<pallas_src>
import functools

import jax
import jax.numpy as jnp
from jax.experimental import pallas as pl
from jax.experimental.pallas import tpu as pltpu


def _channel_attention_kernel(x_ref, w1_ref, b1_ref, w2_ref, b2_ref, o_ref, *,
                              true_len, use_mxu):
    # x_ref/o_ref: (Bt, C, L) in the I/O dtype; w1: (C, H); b1: (1, H); w2: (H, C); b2: (1, C)
    x = x_ref[...]                                                   # native dtype, no f32 copy

    # Squeeze: f32-accumulating sum over the length axis; exact mean via the true length.
    avg = jnp.sum(x, axis=-1, dtype=jnp.float32) * (1.0 / true_len)  # (Bt, C) f32

    # Excitation (two tiny FC layers, H = C // r), once per batch tile.
    if use_mxu:
        # C >= 128: MXU is idle in this kernel, so the dots are effectively free.
        h = jnp.dot(avg, w1_ref[...], preferred_element_type=jnp.float32) + b1_ref[...]
        h = jnp.maximum(h, 0.0)
        s = jnp.dot(h, w2_ref[...], preferred_element_type=jnp.float32) + b2_ref[...]
    else:
        # Small C: VPU/XLU broadcast-multiply + reduce avoids MXU setup/relayout latency.
        h = jnp.sum(avg[:, :, None] * w1_ref[...][None, :, :], axis=1) + b1_ref[...]  # (Bt, H)
        h = jnp.maximum(h, 0.0)
        s = jnp.sum(h[:, :, None] * w2_ref[...][None, :, :], axis=1) + b2_ref[...]    # (Bt, C)
    s = jax.nn.sigmoid(s)

    # Scale in the I/O dtype (sigmoid in (0,1): bf16 multiply is numerically fine).
    # Avoids a full-block f32 temporary that would double VMEM and VPU/store traffic.
    o_ref[...] = x * s.astype(o_ref.dtype)[:, :, None]


def _choose_batch_tile(B, C, L, itemsize, *, target_bytes, min_grid_steps):
    """Batch rows per block: ~target_bytes per block, but keep >= min_grid_steps grid steps
    (v7x has 2 TensorCores; a single-step grid leaves one completely idle)."""
    per_row = max(C * L * itemsize, 1)
    bt = max(1, min(B, target_bytes // per_row))
    if min_grid_steps > 1 and B >= min_grid_steps:
        bt = min(bt, pl.cdiv(B, min_grid_steps))
    return int(bt)


def channel_attention(x, w1, b1, w2, b2, *, batch_tile=None,
                      target_block_bytes=4 << 20, x_buffers=2, donate_x=False):
    """SE channel attention.

    x: (B, C, L) f32/bf16; w1: (C, H); b1: (H,); w2: (H, C); b2: (C,).
    WARNING: donate_x=True aliases x's HBM buffer for the output; the caller must NEVER
    read x again after this call.
    """
    B, C, L = x.shape
    H = w1.shape[1]
    itemsize = jnp.dtype(x.dtype).itemsize

    if batch_tile is None:
        Bt = _choose_batch_tile(B, C, L, itemsize,
                                target_bytes=target_block_bytes, min_grid_steps=2)
    else:
        Bt = max(1, min(int(batch_tile), B))
    # cdiv grid: ragged final block is fine — each row's SE math is independent and
    # out-of-bounds rows of the last block are discarded on writeback.
    grid_b = pl.cdiv(B, Bt)

    w1_f = w1.astype(jnp.float32)
    w2_f = w2.astype(jnp.float32)
    b1_2d = b1.reshape(1, H).astype(jnp.float32)
    b2_2d = b2.reshape(1, C).astype(jnp.float32)

    # Explicit VMEM budget (portable across the 16/32/32 MiB per-generation scoped defaults):
    # x_buffers in-flight input blocks + double-buffered output block + weights + scalars,
    # 25% margin, floored at 16 MiB so Mosaic's internal scratch always fits.
    block_bytes = Bt * C * L * itemsize
    weight_bytes = 4 * (C * H + H + H * C + C)
    vmem_needed = (x_buffers + 2) * block_bytes + 2 * weight_bytes + 16 * Bt * C + (1 << 20)
    vmem_limit = max(int(vmem_needed * 1.25), 16 << 20)

    x_spec_kwargs = {}
    if x_buffers != 2:
        # Deeper input pipeline (e.g. 3 on v7x) if the DMA is still exposed after tile tuning.
        x_spec_kwargs["pipeline_mode"] = pl.Buffered(x_buffers)

    kernel = functools.partial(_channel_attention_kernel,
                               true_len=float(L), use_mxu=(C >= 128))

    out = pl.pallas_call(
        kernel,
        out_shape=jax.ShapeDtypeStruct((B, C, L), x.dtype),
        grid_spec=pltpu.PrefetchScalarGridSpec(
            num_scalar_prefetch=0,
            grid=(grid_b,),
            in_specs=[
                # x: last two dims are the FULL (C, L) extent -> legal for any L, no padding.
                pl.BlockSpec((Bt, C, L), lambda b: (b, 0, 0), **x_spec_kwargs),
                pl.BlockSpec((C, H), lambda b: (0, 0)),   # W1 (full)
                pl.BlockSpec((1, H), lambda b: (0, 0)),   # b1 (full)
                pl.BlockSpec((H, C), lambda b: (0, 0)),   # W2 (full)
                pl.BlockSpec((1, C), lambda b: (0, 0)),   # b2 (full)
            ],
            out_specs=pl.BlockSpec((Bt, C, L), lambda b: (b, 0, 0)),
        ),
        compiler_params=pltpu.CompilerParams(
            dimension_semantics=("parallel",),
            vmem_limit_bytes=vmem_limit,
        ),
        input_output_aliases=({0: 0} if donate_x else {}),
    )(x, w1_f, b1_2d, w2_f, b2_2d)
    return out


def channel_attention_ref(x, w1, b1, w2, b2):
    avg = jnp.mean(x.astype(jnp.float32), axis=-1)
    h = jnp.maximum(avg @ w1 + b1, 0.0)
    s = jax.nn.sigmoid(h @ w2 + b2)
    return x.astype(jnp.float32) * s[:, :, None]


if __name__ == "__main__":
    key = jax.random.PRNGKey(0)
    kx, k1, kb1, k2, kb2, kx2 = jax.random.split(key, 6)

    # Small shapes consistent with the module's SE block: num_channels=32, reduction_ratio=16.
    B, C, L = 2, 32, 128
    R = 16
    H = C // R  # = 2

    x = jax.random.normal(kx, (B, C, L), dtype=jnp.float32)
    # nn.Linear(C, H) / nn.Linear(H, C) weights, stored pre-transposed for avg @ W1 etc.
    w1 = jax.random.normal(k1, (C, H), dtype=jnp.float32) * 0.2
    b1 = jax.random.normal(kb1, (H,), dtype=jnp.float32) * 0.1
    w2 = jax.random.normal(k2, (H, C), dtype=jnp.float32) * 0.2
    b2 = jax.random.normal(kb2, (C,), dtype=jnp.float32) * 0.1

    # f32 path; the tile heuristic forces >= 2 grid steps (megacore-friendly).
    out = jax.block_until_ready(channel_attention(x, w1, b1, w2, b2))
    ref = channel_attention_ref(x, w1, b1, w2, b2)
    assert out.shape == (B, C, L)
    assert jnp.allclose(out, ref, atol=1e-5, rtol=1e-5), "f32 mismatch vs reference"

    # Prime batch + non-128-aligned L: exercises the cdiv grid with a ragged last block and
    # the full-extent (no pad / no slice) ragged-lane path.
    B2, L2 = 5, 100
    x2 = jax.random.normal(kx2, (B2, C, L2), dtype=jnp.float32)
    out2 = jax.block_until_ready(channel_attention(x2, w1, b1, w2, b2))
    ref2 = channel_attention_ref(x2, w1, b1, w2, b2)
    assert out2.shape == (B2, C, L2)
    assert jnp.allclose(out2, ref2, atol=1e-5, rtol=1e-5), "ragged B/L mismatch vs reference"

    # bf16 I/O variant: halves HBM bytes for this bandwidth-bound op; squeeze accumulates in
    # f32, the scale multiply stays in bf16 (sigmoid weights are in (0,1)).
    xb = x.astype(jnp.bfloat16)
    outb = jax.block_until_ready(channel_attention(xb, w1, b1, w2, b2))
    refb = channel_attention_ref(xb, w1, b1, w2, b2)
    assert outb.dtype == jnp.bfloat16
    assert jnp.allclose(outb.astype(jnp.float32), refb, atol=5e-2, rtol=5e-2), "bf16 mismatch"

    print("KERNEL_OK")
</pallas_src>

<mosaic_0001>
module attributes {stable_mosaic.version = 11 : i64} {
  func.func @_channel_attention_kernel(%arg0: i32, %arg1: memref<1x32x128xf32, #tpu.memory_space<vmem>>, %arg2: memref<32x2xf32, #tpu.memory_space<vmem>>, %arg3: memref<1x2xf32, #tpu.memory_space<vmem>>, %arg4: memref<2x32xf32, #tpu.memory_space<vmem>>, %arg5: memref<1x32xf32, #tpu.memory_space<vmem>>, %arg6: memref<1x32x128xf32, #tpu.memory_space<vmem>>) attributes {dimension_semantics = [#tpu.dimension_semantics<parallel>], iteration_bounds = array<i64: 2>, scalar_prefetch = 0 : i64, scratch_operands = 0 : i64, tpu.core_type = #tpu.core_type<tc>, window_params = [{transform_indices = @transform_0, window_bounds = array<i64: 1, 32, 128>}, {pipeline_mode = #tpu.pipeline_mode<synchronous>, transform_indices = @transform_1, window_bounds = array<i64: 32, 2>}, {pipeline_mode = #tpu.pipeline_mode<synchronous>, transform_indices = @transform_2, window_bounds = array<i64: 1, 2>}, {pipeline_mode = #tpu.pipeline_mode<synchronous>, transform_indices = @transform_3, window_bounds = array<i64: 2, 32>}, {pipeline_mode = #tpu.pipeline_mode<synchronous>, transform_indices = @transform_4, window_bounds = array<i64: 1, 32>}, {transform_indices = @transform_5, window_bounds = array<i64: 1, 32, 128>}]} {
    %c0 = arith.constant 0 : index
    %c0_0 = arith.constant 0 : index
    %c0_1 = arith.constant 0 : index
    %0 = vector.load %arg1[%c0, %c0_0, %c0_1] : memref<1x32x128xf32, #tpu.memory_space<vmem>>, vector<1x32x128xf32>
    %cst = arith.constant dense<0.000000e+00> : vector<1x32xf32>
    %1 = vector.multi_reduction <add>, %0, %cst [2] : vector<1x32x128xf32> to vector<1x32xf32>
    %cst_2 = arith.constant 7.812500e-03 : f32
    %2 = vector.broadcast %cst_2 : f32 to vector<1x32xf32>
    %3 = arith.mulf %1, %2 : vector<1x32xf32>
    %4 = vector.shape_cast %3 : vector<1x32xf32> to vector<1x32x1xf32>
    %c0_3 = arith.constant 0 : index
    %c0_4 = arith.constant 0 : index
    %5 = vector.load %arg2[%c0_3, %c0_4] : memref<32x2xf32, #tpu.memory_space<vmem>>, vector<32x2xf32>
    %6 = vector.shape_cast %5 : vector<32x2xf32> to vector<1x32x2xf32>
    %7 = vector.broadcast %4 : vector<1x32x1xf32> to vector<1x32x2xf32>
    %8 = arith.mulf %7, %6 : vector<1x32x2xf32>
    %cst_5 = arith.constant dense<0.000000e+00> : vector<1x2xf32>
    %9 = vector.multi_reduction <add>, %8, %cst_5 [1] : vector<1x32x2xf32> to vector<1x2xf32>
    %c0_6 = arith.constant 0 : index
    %c0_7 = arith.constant 0 : index
    %10 = vector.load %arg3[%c0_6, %c0_7] : memref<1x2xf32, #tpu.memory_space<vmem>>, vector<1x2xf32>
    %11 = arith.addf %9, %10 : vector<1x2xf32>
    %cst_8 = arith.constant 0.000000e+00 : f32
    %12 = vector.broadcast %cst_8 : f32 to vector<1x2xf32>
    %13 = arith.maximumf %11, %12 : vector<1x2xf32>
    %14 = vector.shape_cast %13 : vector<1x2xf32> to vector<1x2x1xf32>
    %c0_9 = arith.constant 0 : index
    %c0_10 = arith.constant 0 : index
    %15 = vector.load %arg4[%c0_9, %c0_10] : memref<2x32xf32, #tpu.memory_space<vmem>>, vector<2x32xf32>
    %16 = vector.shape_cast %15 : vector<2x32xf32> to vector<1x2x32xf32>
    %17 = vector.broadcast %14 : vector<1x2x1xf32> to vector<1x2x32xf32>
    %18 = arith.mulf %17, %16 : vector<1x2x32xf32>
    %cst_11 = arith.constant dense<0.000000e+00> : vector<1x32xf32>
    %19 = vector.multi_reduction <add>, %18, %cst_11 [1] : vector<1x2x32xf32> to vector<1x32xf32>
    %c0_12 = arith.constant 0 : index
    %c0_13 = arith.constant 0 : index
    %20 = vector.load %arg5[%c0_12, %c0_13] : memref<1x32xf32, #tpu.memory_space<vmem>>, vector<1x32xf32>
    %21 = arith.addf %19, %20 : vector<1x32xf32>
    %22 = arith.negf %21 : vector<1x32xf32>
    %23 = math.exp %22 : vector<1x32xf32>
    %cst_14 = arith.constant 1.000000e+00 : f32
    %24 = vector.broadcast %cst_14 : f32 to vector<1x32xf32>
    %25 = arith.addf %24, %23 : vector<1x32xf32>
    %26 = arith.divf %24, %25 : vector<1x32xf32>
    %27 = vector.shape_cast %26 : vector<1x32xf32> to vector<1x32x1xf32>
    %28 = vector.broadcast %27 : vector<1x32x1xf32> to vector<1x32x128xf32>
    %29 = arith.mulf %0, %28 : vector<1x32x128xf32>
    %c0_15 = arith.constant 0 : index
    %c0_16 = arith.constant 0 : index
    %c0_17 = arith.constant 0 : index
    %30 = vector.load %arg6[%c0_15, %c0_16, %c0_17] : memref<1x32x128xf32, #tpu.memory_space<vmem>>, vector<1x32x128xf32>
    tpu.vector_store %arg6[%c0_15, %c0_16, %c0_17], %29 {strides = array<i32>} : memref<1x32x128xf32, #tpu.memory_space<vmem>>, vector<1x32x128xf32>,
    return
  }
  func.func @transform_0(%arg0: i32) -> (i32, i32, i32) {
    %c0_i32 = arith.constant 0 : i32
    %c0_i32_0 = arith.constant 0 : i32
    %c0_i32_1 = arith.constant 0 : i32
    return %arg0, %c0_i32, %c0_i32_0 : i32, i32, i32
  }
  func.func @transform_1(%arg0: i32) -> (i32, i32) {
    %c0_i32 = arith.constant 0 : i32
    %c0_i32_0 = arith.constant 0 : i32
    %c0_i32_1 = arith.constant 0 : i32
    return %c0_i32, %c0_i32_0 : i32, i32
  }
  func.func @transform_2(%arg0: i32) -> (i32, i32) {
    %c0_i32 = arith.constant 0 : i32
    %c0_i32_0 = arith.constant 0 : i32
    %c0_i32_1 = arith.constant 0 : i32
    return %c0_i32, %c0_i32_0 : i32, i32
  }
  func.func @transform_3(%arg0: i32) -> (i32, i32) {
    %c0_i32 = arith.constant 0 : i32
    %c0_i32_0 = arith.constant 0 : i32
    %c0_i32_1 = arith.constant 0 : i32
    return %c0_i32, %c0_i32_0 : i32, i32
  }
  func.func @transform_4(%arg0: i32) -> (i32, i32) {
    %c0_i32 = arith.constant 0 : i32
    %c0_i32_0 = arith.constant 0 : i32
    %c0_i32_1 = arith.constant 0 : i32
    return %c0_i32, %c0_i32_0 : i32, i32
  }
  func.func @transform_5(%arg0: i32) -> (i32, i32, i32) {
    %c0_i32 = arith.constant 0 : i32
    %c0_i32_0 = arith.constant 0 : i32
    %c0_i32_1 = arith.constant 0 : i32
    return %arg0, %c0_i32, %c0_i32_0 : i32, i32, i32
  }
}

</mosaic_0001>

<bundles_post_ra>
// kernel: tpu_custom_call.1
= control target key start
LH: loop header
LB: loop body
LE: loop exit
PB: predicated region body
PF: predicated region fallthrough
CT: control target
= control target key end

     0   :  { %10 = vsyncpa [#allocation3], 0  ;;  %s831_s0 = inlined_call_operand.hbm [shape: f32[2,32,128], index: 0, kind: input, shape index: {}]   ;;  %s832_s1 = inlined_call_operand.vmem [shape: f32[32,2], index: 1, kind: input, shape index: {}]   ;;  %s833_s2 = inlined_call_operand.vmem [shape: f32[1,2], index: 2, kind: input, shape index: {}]   ;;  %s834_s3 = inlined_call_operand.vmem [shape: f32[2,32], index: 3, kind: input, shape index: {}]   ;;  %s835_s4 = inlined_call_operand.vmem [shape: f32[1,32], index: 4, kind: input, shape index: {}]   ;;  %s836_s5 = inlined_call_operand.hbm [shape: f32[2,32,128], index: 5, kind: output, shape index: {}]  }
   0x1   :  { %12 = vsyncpa [#allocation3 + $0x1], 0 }
   0x2   :  { %13 = vsyncpa [#allocation4], 0 }
   0x3   :  { %15 = vsyncpa [#allocation4 + $0x1], 0  ;;  %s628_s18 = smov 0   ;;  %s630_s19 = smov 0  }
   0x4   :  { %s632_s20 = smov 0   ;;  %s634_s21 = smov 0  }
   0x5 LB: > { %s649_s22 = sadd.s32 4294967295, %s590_s21   ;;  %s423_s23 = sadd.s32 4294967294, %s590_s21   ;;  %s590_s21 = sphi %s634_s21, %s849_s21   ;;  %s586_s20 = sphi %s632_s20, %s848_s20   ;;  %s582_s19 = sphi %s630_s19, %s847_s19   ;;  %s578_s18 = sphi %s628_s18, %s846_s18  }
   0x6   : > { %s653_s24 = sadd.s32 1, %s590_s21   ;;  %s28_s25 = sadd.s32 1, %s586_s20 }
   0x7   : > { %s25_s26 = ssub.s32 %s590_s21, %s653_s24  ;;  %p35_p0 = scmp.ne.s32.totalorder %s586_s20, %s582_s19 }
   0x8   : > { %p26_p1 = scmp.eq.s32.totalorder %s25_s26, 0  ;;  %p36_p2 = scmp.eq.s32.totalorder %s590_s21, 0 }
   0x9   : > { %p41_p3 = scmp.ne.s32.totalorder %s582_s19, %s578_s18  ;;  %p42_p4 = scmp.eq.s32.totalorder %s649_s22, 0 }
   0xa   : > { %s665_s27 = scalar_select %p26_p1, %s586_s20, %s28_s25  }
   0xb   : > { %p667_p5 = por %p36_p2, %p35_p0  ;;  %p671_p6 = por %p42_p4, %p41_p3 }
   0xc   : > { %p149_p7 = scmp.eq.s32.totalorder %s649_s22, 1  ;;  %p155_p8 = scmp.eq.s32.totalorder %s423_s23, 1 }
   0xd   : > { %p452_p10 = scmp.lt.s32.totalorder %s590_s21, 2  ;;  %s187_s7 = sand.u32 1, %s586_s20  }
   0xe   : > { %p678_p11 = por %p149_p7, %p35_p0  ;;  %p682_p12 = por %p155_p8, %p41_p3 }
   0xf   : > { %s438_s8 = sshll.u32 %s590_s21, 9  ;;  %s426_s9 = sshll.u32 %s187_s7, 5 }
  0x10   : > { %s840_s30 = scalar_select %p678_p11, 1, 0 }
  0x11   : > { %s841_s6 = scalar_select %p682_p12, 1, 0 }
  0x12   : > { %s691_s12 = scalar_lea.hbm %s831_s0, %s438_s8  ;;  %s191_s13 = scalar_lea.vmem [#allocation2], %s426_s9 }
  0x13   : > { %s198_s14 = sshll.u32 %s191_s13, 4  ;;  %p695_p13 = pnand %p452_p10, %p667_p5  ;;  %s699_s14 = int_to_ptr.vmem [resolvable:$true] %s198_s14 }
  0x14   : > { %s701_s16 = scalar_lea.sflag [#allocation3], %s187_s7  ;;  %s494_s17 = scalar_lea.hbm %s691_s12, 512 }
  0x15   : > { %p495_p0 = scmp.ne.s32.totalorder %s691_s12, %s494_s17  ;;  %p496_p1 = pneg %p695_p13 }
  0x16   : > { %s499_s26 = scalar_lea.hbm %s831_s0, 1024  ;;  %p500_p4 = scmp.lt.u32.totalorder %s691_s12, %s831_s0 }
  0x17   : > { %p497_p2 = pnand %p496_p1, %p495_p0  ;;  %p501_p5 = scmp.lt.u32.totalorder %s499_s26, %s494_s17 }
  0x18   : > { %p503_p8 = scmp.lt.u32.totalorder %s494_s17, %s691_s12 }
  0x19   : > { %p498_p3 = pneg %p497_p2  ;;  %p502_p7 = por %p501_p5, %p500_p4 }
  0x1b   : > { %p504_p10 = por %p503_p8, %p502_p7 }
  0x1d   : > { %p505_p9 = pnand %p504_p10, %p498_p3 }
  0x1f   : > { %508 = shalt.err (!%p505_p9)
}
  0x20   : > { %s509_s7 = scalar_lea.vmem %s699_s14, 512  ;;  %s592_s9 = smov [#allocation2]  }
  0x21   : > { %p510_p0 = scmp.ne.s32.totalorder %s699_s14, %s509_s7  ;;  %s514_s10 = sshll.u32 %s592_s9, 4  ;;  %s515_s10 = int_to_ptr.vmem [resolvable:$false] %s514_s10 }
  0x22   : > { %s516_s11 = scalar_lea.vmem %s515_s10, 1024  ;;  %p517_p11 = scmp.lt.s32.totalorder %s699_s14, %s515_s10 }
  0x23   : > { %p512_p2 = pnand %p510_p0, %p496_p1  ;;  %p518_p4 = scmp.lt.s32.totalorder %s516_s11, %s509_s7 }
  0x25   : > { %p513_p12 = pneg %p512_p2  ;;  %p519_p5 = por %p518_p4, %p517_p11 }
  0x27   : > { %p520_p7 = pnand %p519_p5, %p513_p12 }
  0x29   : > { %523 = shalt.err (!%p520_p7)
}
  0x2a   : > { %s593_s13 = smov 128   ;;  %s594_s17 = smov 8  }
  0x2b   : > { %447 = dma.hbm_to_vmem [thread:$0]  (!%p695_p13), %s691_s12, 512, %s699_s14, %s701_s16, %s593_s13, %s593_s13, %s594_s17  }
  0x2c   : > { %p429_p9 = scmp.ge.s32.totalorder %s590_s21, 1  ;;  %p206_p1 = scmp.lt.s32.totalorder %s590_s21, 3 }
  0x2e   : > { %p207_p3 = pnand %p429_p9, %p206_p1 }
  0x2f   : > { %s732_s23 = sand.u32 (!%p207_p3), 1, %s582_s19  }
  0x30   : > { %210 = sbr.rel (%p207_p3) target bundleno = 532 (0x214), region = 40  ;;  %s430_s25 = sshll.u32 (!%p207_p3), %s732_s23, 5 }
  0x31   : > { %s213_s26 = scalar_lea.sflag (!%p207_p3), [#allocation3], %s732_s23  ;;  %s216_s28 = scalar_lea.vmem (!%p207_p3), [#allocation2], %s430_s25 }
  0x37   : > { %569 = dma.done.wait (%p671_p6), %s213_s26, 512  }
  0x38   : > { %571 = vsyncadd (%p671_p6), %s213_s26, 4294966784  ;;  %v742_v0 = vld [vmem:[%s216_s28] sm:$0xff]  ;;  %v744_v1 = vld [vmem:[%s216_s28 + $0x10] sm:$0xff]  ;;  %vm267_vm0 = vcmask 15360   ;;  %v284_v30 = vlaneseq  ;;  %vm293_vm1 = vcmask 254976   ;;  %s242_s29 = scalar_lea.vmem [#allocation5], %s430_s25 }
  0x39   : > { %247 = vadd.xlane.f32.xlu0 %v742_v0  ;;  %251 = vadd.xlane.f32.xlu1 %v744_v1  ;;  %v748_v2 = vld [vmem:[%s216_s28 + $0x8] sm:$0xff]  ;;  %v750_v3 = vld [vmem:[%s216_s28 + $0x18] sm:$0xff]  ;;  %v259_v7 = vld [vmem:[%s832_s1] sm:$0xff]  ;;  %s350_s12 = sshll.u32 %s242_s29, 4  ;;  %s439_s14 = sshll.u32 %s649_s22, 9  ;;  %s781_s12 = int_to_ptr.vmem [resolvable:$true] %s350_s12 }
  0x3a   : > { %v261_v9 = vld [vmem:[%s832_s1 + $0x10] sm:$0xff]  ;;  %v260_v10 = vld [vmem:[%s832_s1 + $0x8] sm:$0xff]  ;;  %v262_v12 = vld [vmem:[%s832_s1 + $0x18] sm:$0xff]  ;;  %v285_v33 = vshrl.u32 %v284_v30, 7  ;;  %s786_s8 = scalar_lea.hbm %s836_s5, %s439_s14  ;;  %s337_s25 = scalar_lea.sflag [#allocation4], %s732_s23 }
  0x3b   : > { %v281_v34 = vld [vmem:[%s833_s2] sm:$0x1]  ;;  %s524_s7 = scalar_lea.vmem %s781_s12, 512  ;;  %p843_p11 = scmp.ne.s32.totalorder %s840_s30, 0 }
  0x3c   : > { %v286_v37 = vsub.s32 0, %v285_v33  ;;  %v291_v40 = vld [vmem:[%s834_s3] sm:$0x3]  ;;  %p525_p6 = scmp.ne.s32.totalorder %s781_s12, %s524_s7  ;;  %s595_s22 = smov [#allocation5]  }
  0x3d   : > { %249 = vadd.xlane.f32.xlu0 %v748_v2  ;;  %253 = vadd.xlane.f32.xlu1 %v750_v3  ;;  %v301_v49 = vld [vmem:[%s835_s4] sm:$0x1]  ;;  %s528_s9 = sshll.u32 %s595_s22, 4  ;;  %s529_s9 = int_to_ptr.vmem [resolvable:$false] %s528_s9 }
  0x3e   : > { %p526_p12 = pnand %p525_p6, %p843_p11  ;;  %s530_s10 = scalar_lea.vmem %s529_s9, 1024 }
  0x3f   : > { %p531_p8 = scmp.lt.s32.totalorder %s781_s12, %s529_s9  ;;  %p532_p10 = scmp.lt.s32.totalorder %s530_s10, %s524_s7 }
  0x40   : > { %p527_p13 = pneg %p526_p12 }
  0x41   : > { %p533_p0 = por %p532_p10, %p531_p8 }
  0x43   : > { %p534_p2 = pnand %p533_p0, %p527_p13 }
  0xc6   : > { %v248_v4 = vpop.xlane.xlu0 %247  ;;  %v252_v5 = vpop.xlane.xlu1 %251 }
  0xc7   : > { %v255_v6 = vmul.f32 0.0078125, %v248_v4  ;;  %v257_v8 = vmul.f32 0.0078125, %v252_v5 }
  0xc9   : > { %v263_v14 = vmul.f32 %v259_v7, %v255_v6  ;;  %v265_v17 = vmul.f32 %v261_v9, %v257_v8 }
  0xca   : > { %v250_v11 = vpop.xlane.xlu0 %249  ;;  %v254_v13 = vpop.xlane.xlu1 %253 }
  0xcb   : > { %v256_v15 = vmul.f32 0.0078125, %v250_v11  ;;  %v258_v16 = vmul.f32 0.0078125, %v254_v13  ;;  %v268_v20 = vsel %vm267_vm0, %v263_v14, 0.0  ;;  %v271_v23 = vsel %vm267_vm0, %v265_v17, 0.0 }
  0xcd   : > { %v264_v18 = vmul.f32 %v260_v10, %v256_v15  ;;  %v266_v19 = vmul.f32 %v262_v12, %v258_v16 }
  0xcf   : > { %v269_v21 = vsel %vm267_vm0, %v264_v18, 0.0  ;;  %v273_v24 = vsel %vm267_vm0, %v266_v19, 0.0 }
  0xd0   : > { %v270_v22 = vadd.f32 %v269_v21, %v268_v20 }
  0xd2   : > { %v272_v25 = vadd.f32 %v271_v23, %v270_v22 }
  0xd4   : > { %v274_v26 = vadd.f32 %v273_v24, %v272_v25 }
  0xd6   : > { %v275_v27 = vrot.slane %v274_v26, 4 }
  0xd8   : > { %v276_v28 = vadd.f32 %v275_v27, %v274_v26 }
  0xda   : > { %v277_v29 = vrot.slane %v276_v28, 2 }
  0xdc   : > { %v278_v31 = vadd.f32 %v277_v29, %v276_v28 }
  0xde   : > { %v279_v32 = vrot.slane %v278_v31, 1 }
  0xe0   : > { %v280_v35 = vadd.f32 %v279_v32, %v278_v31 }
  0xe2   : > { %v282_v36 = vadd.f32 %v281_v34, %v280_v35 }
  0xe4   : > { %v283_v38 = vmax.f32 %v282_v36, 0.0 }
  0xe6   : > { %v287_v39 = vrot.slane %v283_v38, %v286_v37 }
  0xe8   : > { %289 = vbcast.lane.b32.xlu0 %v287_v39, 256 }
 0x15a   : > { %v290_v41 = vpop.permute.xlu0 %289 }
 0x15b   : > { %v292_v42 = vmul.f32 %v291_v40, %v290_v41 }
 0x15d   : > { %v294_v43 = vsel %vm293_vm1, %v292_v42, 0.0 }
 0x15e   : > { %v295_v44 = vrot.slane %v294_v43, 4 }
 0x160   : > { %v296_v45 = vadd.f32 %v295_v44, %v294_v43 }
 0x162   : > { %v297_v46 = vrot.slane %v296_v45, 2 }
 0x164   : > { %v298_v47 = vadd.f32 %v297_v46, %v296_v45 }
 0x166   : > { %v299_v48 = vrot.slane %v298_v47, 1 }
 0x168   : > { %v300_v50 = vadd.f32 %v299_v48, %v298_v47 }
 0x16a   : > { %v302_v51 = vadd.f32 %v301_v49, %v300_v50 }
 0x16c   : > { %v432_v52 = vmul.f32 -1.442695, %v302_v51 }
 0x16e   : > { %490 = vpow2.f32 %v432_v52 }
 0x178   : > { %v491_v53 = vpop.eup %490 }
 0x179   : > { %v306_v54 = vadd.f32 1.0, %v491_v53 }
 0x17b   : > { %492 = vrcp.f32 %v306_v54 }
 0x185   : > { %v493_v55 = vpop.eup %492 }
 0x186   : > { %v312_v56 = vrot.slane %v493_v55, %v286_v37 }
 0x188   : > { %326 = vbcast.lane.b32.xlu0 %v312_v56, 280  ;;  %314 = vbcast.lane.b32.xlu1 %v312_v56, 256 }
 0x18c   : > { %318 = vbcast.lane.b32.xlu1 %v312_v56, 264 }
 0x190   : > { %322 = vbcast.lane.b32.xlu1 %v312_v56, 272 }
 0x1fa   : > { %v327_v57 = vpop.permute.xlu0 %326  ;;  %v315_v58 = vpop.permute.xlu1 %314 }
 0x1fb   : > { %v331_v59 = vmul.f32 %v327_v57, %v750_v3  ;;  %v328_v60 = vmul.f32 %v315_v58, %v742_v0 }
 0x1fd   : > { %335 = vst [vmem:[%s242_s29 + $0x18] sm:$0xff] %v331_v59  ;;  %332 = vst [vmem:[%s242_s29] sm:$0xff] %v328_v60 }
 0x1fe   : > { %v319_v61 = vpop.permute.xlu1 %318 }
 0x1ff   : > { %v329_v62 = vmul.f32 %v319_v61, %v748_v2 }
 0x201   : > { %333 = vst [vmem:[%s242_s29 + $0x8] sm:$0xff] %v329_v62 }
 0x202   : > { %v323_v63 = vpop.permute.xlu1 %322 }
 0x203   : > { %v330_v0 = vmul.f32 %v323_v63, %v744_v1 }
 0x205   : > { %334 = vst [vmem:[%s242_s29 + $0x10] sm:$0xff] %v330_v0 }
 0x206   : > { %537 = shalt.err (!%p534_p2)
}
 0x207   : > { %s538_s11 = scalar_lea.hbm %s786_s8, 512  ;;  %s542_s26 = scalar_lea.hbm %s836_s5, 1024 }
 0x208   : > { %p539_p4 = scmp.ne.s32.totalorder %s786_s8, %s538_s11  ;;  %p543_p9 = scmp.lt.u32.totalorder %s786_s8, %s836_s5 }
 0x209   : > { %p544_p1 = scmp.lt.u32.totalorder %s542_s26, %s538_s11  ;;  %p546_p6 = scmp.lt.u32.totalorder %s538_s11, %s786_s8 }
 0x20a   : > { %p540_p5 = pnand %p539_p4, %p843_p11 }
 0x20b   : > { %p545_p3 = por %p544_p1, %p543_p9 }
 0x20c   : > { %p541_p7 = pneg %p540_p5 }
 0x20d   : > { %p547_p12 = por %p546_p6, %p545_p3 }
 0x20f   : > { %p548_p13 = pnand %p547_p12, %p541_p7 }
 0x211   : > { %551 = shalt.err (!%p548_p13)
}
 0x212   : > { %s596_s14 = smov 128   ;;  %s597_s15 = smov 8  }
 0x213   : > { %442 = dma.vmem_to_hbm [thread:$0]  (%p843_p11), %s781_s12, 512, %s786_s8, %s337_s25, %s596_s14, %s596_s14, %s597_s15  }
 0x214 PF: > { %s365_s16 = sand.u32 1, %s578_s18   ;;  %p844_p8 = scmp.ne.s32.totalorder %s841_s6, 0 }
 0x215   : > { %p845_p10 = scmp.ge.s32.totalorder %s590_s21, 2  ;;  %s366_s7 = scalar_lea.sflag [#allocation4], %s365_s16 }
 0x217   : > { %p449_p0 = pnand %p845_p10, %p844_p8 }
 0x219   : > { %573 = dma.done.wait (!%p449_p0), %s366_s7, 512  }
 0x21a   : > { %575 = vsyncadd (!%p449_p0), %s366_s7, 4294966784  ;;  %p18_p2 = scmp.ge.s32.totalorder %s653_s24, 4   ;;  %s846_s18 = smov %s582_s19 }
 0x21b   : > { %s847_s19 = smov %s586_s20  ;;  %s848_s20 = smov %s665_s27 }
 0x21c   : > { %s849_s21 = smov %s653_s24  ;;  %20 = sbr.rel (!%p18_p2) target bundleno = 5 (0x5), region = 85 }
 0x223   :  { %371 = vsyncpa [#allocation3], 1 }
 0x224   :  { %373 = vsyncpa [#allocation3 + $0x1], 1 }
 0x225   :  { %374 = vsyncpa [#allocation4], 1 }
 0x226   :  { %376 = vsyncpa [#allocation4 + $0x1], 1 }

</bundles_post_ra>
